<compile_context>
chip_gen: v7x
topology: tpu7x:2x2x1
jax: 0.10.0
libtpu: 0.0.40
codegen_flags: <defaults>
</compile_context>

<pallas_src>
import math

import jax
import jax.numpy as jnp
from jax import lax
from jax.experimental import pallas as pl
from jax.experimental.pallas import tpu as pltpu


def _attention_embeddings_kernel(x_ref, g_ref, wqkv_ref, mlp_ref, out_ref):
    # Per grid step tiles:
    #   x_ref   : (TB, S1, D)   input_xs batch block
    #   g_ref   : (TB, S2, D)   g_embe batch block
    #   wqkv    : (D, 3D)       [Wq^T * 1/sqrt(D) | Wk^T | Wv^T]
    #   mlp     : (D+5, H)      rows [0:D]=W1^T, [D]=b1, [D+1:D+3]=W2,
    #                           [D+3,0]=b2[0], [D+4,0]=b2[1]
    #   out     : (2, TB*S1)    lane-dense output slab (all S1 rows carried)
    TB, S1, D = x_ref.shape
    S2 = g_ref.shape[1]
    L = S1 + S2
    f32 = jnp.float32

    x = x_ref[...]                                   # (TB, S1, D)
    g = g_ref[...]                                   # (TB, S2, D)

    # cat(input_xs, g_embe) lives only in VMEM / vregs (never touches HBM).
    kv = jnp.concatenate([x, g], axis=1)             # (TB, L, D)

    # Single fused Q|K|V projection: 96-lane-wide MXU output. The Q columns
    # computed for the g rows are discarded (free under MXU slack).
    p = jnp.dot(kv.reshape(TB * L, D), wqkv_ref[...],
                preferred_element_type=f32).reshape(TB, L, 3 * D)

    qry = p[:, :S1, 0:D]                             # (TB, S1, D) all rows, pre-scaled
    key = p[:, :, D:2 * D]                           # (TB, L, D)
    val = p[:, :, 2 * D:3 * D]                       # (TB, L, D)

    # Scaled dot-product attention (batched; contract on feature dim, no .T).
    score = lax.dot_general(qry, key, (((2,), (2,)), ((0,), (0,))),
                            preferred_element_type=f32)          # (TB, S1, L)
    m = jnp.max(score, axis=-1, keepdims=True)
    e = jnp.exp(score - m)
    denom = jnp.sum(e, axis=-1, keepdims=True)                    # (TB, S1, 1)
    ctx = lax.dot_general(e, val, (((2,), (1,)), ((0,), (0,))),
                          preferred_element_type=f32)             # (TB, S1, D)
    # Exact normalization: denom is tiny, the divide is free and keeps the
    # kernel bit-comparable to the reference.
    ctx = ctx / denom

    # MLP head: linear1 -> tanh -> linear2 (weights unpacked from one buffer).
    w1t = mlp_ref[0:D, :]                                         # (D, H)
    b1 = mlp_ref[D:D + 1, :]                                      # (1, H)
    w2 = mlp_ref[D + 1:D + 3, :]                                  # (2, H)
    b2 = mlp_ref[D + 3:D + 5, 0:1]                                # (2, 1)

    h = jnp.tanh(jnp.dot(ctx.reshape(TB * S1, D), w1t,
                         preferred_element_type=f32) + b1)        # (TB*S1, H)
    # W2 @ H^T -> (2, TB*S1): lane-dense output store.
    y = lax.dot_general(w2, h, (((1,), (1,)), ((), ())),
                        preferred_element_type=f32) + b2
    out_ref[...] = y.astype(out_ref.dtype)


def attention_embeddings_forward(input_xs, g_embe, len_quest_ids, params,
                                 *, batch_block=None):
    """Pallas implementation of AttentionEmbeddings.forward.

    input_xs : (B, S1, D) float32
    g_embe   : (B, S2, D) float32
    returns  : (B, S1 - len_quest_ids - 1, 2) float32
    """
    B, S1, D = input_xs.shape
    _, S2, _ = g_embe.shape
    lq = int(len_quest_ids)
    Q = S1 - lq - 1
    H = params["w1"].shape[0]
    assert Q > 0 and H >= 1

    f32 = jnp.float32

    # Single grid step by default (overhead-bound kernel). Crude VMEM guard so
    # the heuristic stays safe if B/S1/S2 ever scale (double-buffered inputs
    # kept well under the scoped default on all of v5e/v6e/v7x).
    if batch_block is None:
        TB = B
        per_step_bytes = 4 * TB * (S1 + S2) * D * 2   # f32, 2x double buffer
        while per_step_bytes > (16 << 20) and TB % 2 == 0:
            TB //= 2
            per_step_bytes //= 2
    else:
        TB = int(batch_block)
    assert B % TB == 0, "batch_block must divide the batch size"
    NB = B // TB

    # Loop-invariant weight prep on the host: transposes, scale fold, packing.
    scale = 1.0 / math.sqrt(D)
    wqkv = jnp.concatenate([params["wq"].astype(f32).T * scale,
                            params["wk"].astype(f32).T,
                            params["wv"].astype(f32).T], axis=1)   # (D, 3D)

    mlp = jnp.zeros((D + 5, H), f32)
    mlp = mlp.at[0:D, :].set(params["w1"].astype(f32).T)           # W1^T
    mlp = mlp.at[D, :].set(params["b1"].astype(f32))               # b1
    mlp = mlp.at[D + 1:D + 3, :].set(params["w2"].astype(f32))     # W2
    mlp = mlp.at[D + 3, 0].set(params["b2"][0].astype(f32))        # b2[0]
    mlp = mlp.at[D + 4, 0].set(params["b2"][1].astype(f32))        # b2[1]

    out = pl.pallas_call(
        _attention_embeddings_kernel,
        out_shape=jax.ShapeDtypeStruct((NB, 2, TB * S1), f32),
        grid=(NB,),
        in_specs=[
            pl.BlockSpec((TB, S1, D), lambda b: (b, 0, 0)),   # input_xs block
            pl.BlockSpec((TB, S2, D), lambda b: (b, 0, 0)),   # g_embe block
            pl.BlockSpec((D, 3 * D), lambda b: (0, 0)),       # fused Wq|Wk|Wv
            pl.BlockSpec((D + 5, H), lambda b: (0, 0)),       # packed MLP/bias
        ],
        out_specs=pl.BlockSpec((None, 2, TB * S1), lambda b: (b, 0, 0)),
        compiler_params=pltpu.CompilerParams(
            dimension_semantics=("parallel",)),
    )(input_xs.astype(f32), g_embe.astype(f32), wqkv, mlp)

    # (NB, 2, TB*S1) -> (B, S1, 2), then take the query rows in the wrapper
    # (the unaligned row slice never enters the kernel).
    full = out.reshape(NB, 2, TB, S1).transpose(0, 2, 3, 1).reshape(B, S1, 2)
    return full[:, lq:S1 - 1, :]


def _reference_forward(input_xs, g_embe, len_quest_ids, params):
    """Pure-JAX reference mirroring the PyTorch module exactly."""
    D = input_xs.shape[-1]
    concat = jnp.concatenate([input_xs, g_embe], axis=1)
    key = concat @ params["wk"].T
    value = concat @ params["wv"].T
    query = input_xs[:, len_quest_ids:-1, :] @ params["wq"].T
    score = jnp.einsum("bqd,bkd->bqk", query, key) / math.sqrt(D)
    attn = jax.nn.softmax(score, axis=-1)
    context = jnp.einsum("bqk,bkd->bqd", attn, value)
    y = jnp.tanh(context @ params["w1"].T + params["b1"])
    y = y @ params["w2"].T + params["b2"]
    return y


if __name__ == "__main__":
    # Shapes implied by the module: input_size=D, hidden_nodes=H,
    # input_xs (B, S1, D), g_embe (B, S2, D); Q = S1 - len_quest_ids - 1.
    B, S1, S2, D, H = 4, 16, 8, 32, 32
    len_quest_ids = 7          # query = input_xs[:, 7:-1, :] -> Q = 8

    key = jax.random.PRNGKey(0)
    ks = jax.random.split(key, 9)

    def init(k, shape, fan_in):
        bound = 1.0 / math.sqrt(fan_in)
        return jax.random.uniform(k, shape, jnp.float32, -bound, bound)

    params = {
        "wq": init(ks[0], (D, D), D),
        "wk": init(ks[1], (D, D), D),
        "wv": init(ks[2], (D, D), D),
        "w1": init(ks[3], (H, D), D),
        "b1": init(ks[4], (H,), D),
        "w2": init(ks[5], (2, H), H),
        "b2": init(ks[6], (2,), H),
    }

    input_xs = jax.random.normal(ks[7], (B, S1, D), jnp.float32)
    g_embe = jax.random.normal(ks[8], (B, S2, D), jnp.float32)

    out = attention_embeddings_forward(input_xs, g_embe, len_quest_ids, params)
    out = jax.block_until_ready(out)

    # Reference at full f32 matmul precision so the comparison is tight
    # (the kernel no longer uses the approximate EUP reciprocal).
    with jax.default_matmul_precision("float32"):
        ref = _reference_forward(input_xs, g_embe, len_quest_ids, params)
        ref = jax.block_until_ready(ref)

    assert out.shape == (B, S1 - len_quest_ids - 1, 2), out.shape
    err = float(jnp.max(jnp.abs(out - ref)))
    assert jnp.allclose(out, ref, atol=1e-4, rtol=1e-4), f"max abs err {err}"

    print("KERNEL_OK")
</pallas_src>

<mosaic_0001>
module attributes {stable_mosaic.version = 11 : i64} {
  func.func @_attention_embeddings_kernel(%arg0: i32, %arg1: memref<4x16x32xf32, #tpu.memory_space<vmem>>, %arg2: memref<4x8x32xf32, #tpu.memory_space<vmem>>, %arg3: memref<32x96xf32, #tpu.memory_space<vmem>>, %arg4: memref<37x32xf32, #tpu.memory_space<vmem>>, %arg5: memref<1x2x64xf32, #tpu.memory_space<vmem>>) attributes {dimension_semantics = [#tpu.dimension_semantics<parallel>], iteration_bounds = array<i64: 1>, scalar_prefetch = 0 : i64, scratch_operands = 0 : i64, tpu.core_type = #tpu.core_type<tc>, window_params = [{transform_indices = @transform_0, window_bounds = array<i64: 4, 16, 32>}, {transform_indices = @transform_1, window_bounds = array<i64: 4, 8, 32>}, {pipeline_mode = #tpu.pipeline_mode<synchronous>, transform_indices = @transform_2, window_bounds = array<i64: 32, 96>}, {pipeline_mode = #tpu.pipeline_mode<synchronous>, transform_indices = @transform_3, window_bounds = array<i64: 37, 32>}, {transform_indices = @transform_4, window_bounds = array<i64: 1, 2, 64>}]} {
    %c0 = arith.constant 0 : index
    %c0_0 = arith.constant 0 : index
    %c0_1 = arith.constant 0 : index
    %0 = vector.load %arg1[%c0, %c0_0, %c0_1] : memref<4x16x32xf32, #tpu.memory_space<vmem>>, vector<4x16x32xf32>
    %c0_2 = arith.constant 0 : index
    %c0_3 = arith.constant 0 : index
    %c0_4 = arith.constant 0 : index
    %1 = vector.load %arg2[%c0_2, %c0_3, %c0_4] : memref<4x8x32xf32, #tpu.memory_space<vmem>>, vector<4x8x32xf32>
    %2 = tpu.concatenate %0, %1 in 1 : vector<4x16x32xf32>, vector<4x8x32xf32> -> vector<4x24x32xf32>
    %3 = vector.shape_cast %2 : vector<4x24x32xf32> to vector<96x32xf32>
    %c0_5 = arith.constant 0 : index
    %c0_6 = arith.constant 0 : index
    %4 = vector.load %arg3[%c0_5, %c0_6] : memref<32x96xf32, #tpu.memory_space<vmem>>, vector<32x96xf32>
    %cst = arith.constant dense<0.000000e+00> : vector<96x96xf32>
    %5 = tpu.matmul %3, %4, %cst {dimension_numbers = #tpu.dot_dimension_numbers<[1], [0], [0], [1], [0, 0, 1, 1], [], []>} : vector<96x32xf32>, vector<32x96xf32>, vector<96x96xf32> -> vector<96x96xf32>
    %6 = vector.shape_cast %5 : vector<96x96xf32> to vector<4x24x96xf32>
    %7 = vector.extract_strided_slice %6 {offsets = [0, 0, 0], sizes = [4, 16, 32], strides = [1, 1, 1]} : vector<4x24x96xf32> to vector<4x16x32xf32>
    %8 = vector.extract_strided_slice %6 {offsets = [0, 0, 32], sizes = [4, 24, 32], strides = [1, 1, 1]} : vector<4x24x96xf32> to vector<4x24x32xf32>
    %9 = vector.extract_strided_slice %6 {offsets = [0, 0, 64], sizes = [4, 24, 32], strides = [1, 1, 1]} : vector<4x24x96xf32> to vector<4x24x32xf32>
    %cst_7 = arith.constant dense<0.000000e+00> : vector<4x16x24xf32>
    %10 = tpu.matmul %7, %8, %cst_7 {dimension_numbers = #tpu.dot_dimension_numbers<[2], [2], [1], [1], [0, 0, 0, 1, 1, 1], [0], [0]>} : vector<4x16x32xf32>, vector<4x24x32xf32>, vector<4x16x24xf32> -> vector<4x16x24xf32>
    %cst_8 = arith.constant dense<0xFF800000> : vector<4x16xf32>
    %11 = vector.multi_reduction <maximumf>, %10, %cst_8 [2] : vector<4x16x24xf32> to vector<4x16xf32>
    %12 = vector.shape_cast %11 : vector<4x16xf32> to vector<4x16x1xf32>
    %13 = vector.broadcast %12 : vector<4x16x1xf32> to vector<4x16x24xf32>
    %14 = arith.subf %10, %13 : vector<4x16x24xf32>
    %15 = math.exp %14 : vector<4x16x24xf32>
    %cst_9 = arith.constant dense<0.000000e+00> : vector<4x16xf32>
    %16 = vector.multi_reduction <add>, %15, %cst_9 [2] : vector<4x16x24xf32> to vector<4x16xf32>
    %17 = vector.shape_cast %16 : vector<4x16xf32> to vector<4x16x1xf32>
    %cst_10 = arith.constant dense<0.000000e+00> : vector<4x16x32xf32>
    %18 = tpu.matmul %15, %9, %cst_10 {dimension_numbers = #tpu.dot_dimension_numbers<[2], [1], [1], [2], [0, 0, 0, 1, 1, 2], [0], [0]>} : vector<4x16x24xf32>, vector<4x24x32xf32>, vector<4x16x32xf32> -> vector<4x16x32xf32>
    %19 = vector.broadcast %17 : vector<4x16x1xf32> to vector<4x16x32xf32>
    %20 = arith.divf %18, %19 : vector<4x16x32xf32>
    %c0_11 = arith.constant 0 : index
    %c0_12 = arith.constant 0 : index
    %21 = vector.load %arg4[%c0_11, %c0_12] : memref<37x32xf32, #tpu.memory_space<vmem>>, vector<32x32xf32>
    %c32 = arith.constant 32 : index
    %c0_13 = arith.constant 0 : index
    %22 = vector.load %arg4[%c32, %c0_13] : memref<37x32xf32, #tpu.memory_space<vmem>>, vector<1x32xf32>
    %c33 = arith.constant 33 : index
    %c0_14 = arith.constant 0 : index
    %23 = vector.load %arg4[%c33, %c0_14] : memref<37x32xf32, #tpu.memory_space<vmem>>, vector<2x32xf32>
    %c35 = arith.constant 35 : index
    %c0_15 = arith.constant 0 : index
    %24 = vector.load %arg4[%c35, %c0_15] : memref<37x32xf32, #tpu.memory_space<vmem>>, vector<2x1xf32>
    %25 = vector.shape_cast %20 : vector<4x16x32xf32> to vector<64x32xf32>
    %cst_16 = arith.constant dense<0.000000e+00> : vector<64x32xf32>
    %26 = tpu.matmul %25, %21, %cst_16 {dimension_numbers = #tpu.dot_dimension_numbers<[1], [0], [0], [1], [0, 0, 1, 1], [], []>} : vector<64x32xf32>, vector<32x32xf32>, vector<64x32xf32> -> vector<64x32xf32>
    %27 = vector.broadcast %22 : vector<1x32xf32> to vector<64x32xf32>
    %28 = arith.addf %26, %27 : vector<64x32xf32>
    %29 = math.tanh %28 : vector<64x32xf32>
    %cst_17 = arith.constant dense<0.000000e+00> : vector<2x64xf32>
    %30 = tpu.matmul %23, %29, %cst_17 {dimension_numbers = #tpu.dot_dimension_numbers<[1], [1], [0], [0], [0, 0, 1, 0], [], []>} : vector<2x32xf32>, vector<64x32xf32>, vector<2x64xf32> -> vector<2x64xf32>
    %31 = vector.broadcast %24 : vector<2x1xf32> to vector<2x64xf32>
    %32 = arith.addf %30, %31 : vector<2x64xf32>
    %c0_18 = arith.constant 0 : index
    %c0_19 = arith.constant 0 : index
    %c0_20 = arith.constant 0 : index
    %33 = vector.load %arg5[%c0_18, %c0_19, %c0_20] : memref<1x2x64xf32, #tpu.memory_space<vmem>>, vector<1x2x64xf32>
    %34 = vector.shape_cast %33 : vector<1x2x64xf32> to vector<2x64xf32>
    %35 = vector.shape_cast %32 : vector<2x64xf32> to vector<1x2x64xf32>
    tpu.vector_store %arg5[%c0_18, %c0_19, %c0_20], %35 {strides = array<i32>} : memref<1x2x64xf32, #tpu.memory_space<vmem>>, vector<1x2x64xf32>,
    return
  }
  func.func @transform_0(%arg0: i32) -> (i32, i32, i32) {
    %c0_i32 = arith.constant 0 : i32
    %c0_i32_0 = arith.constant 0 : i32
    %c0_i32_1 = arith.constant 0 : i32
    return %arg0, %c0_i32, %c0_i32_0 : i32, i32, i32
  }
  func.func @transform_1(%arg0: i32) -> (i32, i32, i32) {
    %c0_i32 = arith.constant 0 : i32
    %c0_i32_0 = arith.constant 0 : i32
    %c0_i32_1 = arith.constant 0 : i32
    return %arg0, %c0_i32, %c0_i32_0 : i32, i32, i32
  }
  func.func @transform_2(%arg0: i32) -> (i32, i32) {
    %c0_i32 = arith.constant 0 : i32
    %c0_i32_0 = arith.constant 0 : i32
    %c0_i32_1 = arith.constant 0 : i32
    return %c0_i32, %c0_i32_0 : i32, i32
  }
  func.func @transform_3(%arg0: i32) -> (i32, i32) {
    %c0_i32 = arith.constant 0 : i32
    %c0_i32_0 = arith.constant 0 : i32
    %c0_i32_1 = arith.constant 0 : i32
    return %c0_i32, %c0_i32_0 : i32, i32
  }
  func.func @transform_4(%arg0: i32) -> (i32, i32, i32) {
    %c0_i32 = arith.constant 0 : i32
    %c0_i32_0 = arith.constant 0 : i32
    %c0_i32_1 = arith.constant 0 : i32
    return %arg0, %c0_i32, %c0_i32_0 : i32, i32, i32
  }
}

</mosaic_0001>

<bundles_post_ra>
// kernel: tpu_custom_call.1
= control target key start
LH: loop header
LB: loop body
LE: loop exit
PB: predicated region body
PF: predicated region fallthrough
CT: control target
= control target key end

     0   :  { %9 = vsyncpa [#allocation3], 0  ;;  %s2070_s0 = inlined_call_operand.vmem [shape: f32[4,16,32], index: 0, kind: input, shape index: {}]   ;;  %s2071_s1 = inlined_call_operand.hbm [shape: f32[4,8,32], index: 1, kind: input, shape index: {}]   ;;  %s2072_s2 = inlined_call_operand.hbm [shape: f32[32,96], index: 2, kind: input, shape index: {}]   ;;  %s2073_s3 = inlined_call_operand.vmem [shape: f32[37,32], index: 3, kind: input, shape index: {}]   ;;  %s2074_s4 = inlined_call_operand.hbm [shape: f32[1,2,64], index: 4, kind: output, shape index: {}]  }
   0x1   :  { %10 = vsyncpa [#allocation6], 0 }
   0x2   :  { %11 = vsyncpa [#allocation4], 0  ;;  %s1834_s15 = smov [#allocation2]   ;;  %s1762_s19 = scalar_lea.hbm %s2071_s1, 512 }
   0x3   :  { %s19_s16 = sshll.u32 %s1834_s15, 4  ;;  %p1763_p0 = scmp.ne.s32.totalorder %s2071_s1, %s1762_s19  ;;  %s20_s16 = int_to_ptr.vmem [resolvable:$true] %s19_s16 }
   0x4   :  { %p1766_p1 = scmp.lt.u32.totalorder %s1762_s19, %s2071_s1 }
   0x6   :  { %p1768_p2 = pnand %p1766_p1, %p1763_p0 }
   0x8   :  { %1771 = shalt.err (!%p1768_p2)
}
   0x9   :  { %s1772_s24 = scalar_lea.vmem %s20_s16, 512  ;;  %p1777_p4 = scmp.lt.s32.totalorder %s20_s16, %s20_s16 }
   0xa   :  { %p1773_p3 = scmp.ne.s32.totalorder %s20_s16, %s1772_s24  ;;  %p1778_p5 = scmp.lt.s32.totalorder %s1772_s24, %s1772_s24 }
   0xc   :  { %p1779_p6 = por %p1778_p5, %p1777_p4 }
   0xe   :  { %p1780_p7 = pnand %p1779_p6, %p1773_p3 }
  0x10   :  { %1783 = shalt.err (!%p1780_p7)
}
  0x11   :  { %s1835_s25 = smov 128   ;;  %s1836_s26 = smov 8  }
  0x12   :  { %25 = dma.hbm_to_vmem [thread:$0]  %s2071_s1, 512, %s20_s16, [#allocation3], %s1835_s25, %s1835_s25, %s1836_s26  }
  0x13   :  { %s1837_s29 = smov [#allocation5]   ;;  %s1784_s7 = scalar_lea.hbm %s2072_s2, 512 }
  0x14   :  { %s31_s30 = sshll.u32 %s1837_s29, 4  ;;  %p1785_p8 = scmp.ne.s32.totalorder %s2072_s2, %s1784_s7  ;;  %s32_s30 = int_to_ptr.vmem [resolvable:$true] %s31_s30 }
  0x15   :  { %p1788_p9 = scmp.lt.u32.totalorder %s1784_s7, %s2072_s2 }
  0x17   :  { %p1790_p10 = pnand %p1788_p9, %p1785_p8 }
  0x19   :  { %1793 = shalt.err (!%p1790_p10)
}
  0x1a   :  { %s1794_s12 = scalar_lea.vmem %s32_s30, 512  ;;  %p1799_p12 = scmp.lt.s32.totalorder %s32_s30, %s32_s30 }
  0x1b   :  { %p1795_p11 = scmp.ne.s32.totalorder %s32_s30, %s1794_s12  ;;  %p1800_p13 = scmp.lt.s32.totalorder %s1794_s12, %s1794_s12 }
  0x1d   :  { %p1801_p0 = por %p1800_p13, %p1799_p12 }
  0x1f   :  { %p1802_p1 = pnand %p1801_p0, %p1795_p11 }
  0x21   :  { %1805 = shalt.err (!%p1802_p1)
}
  0x22   :  { %37 = dma.hbm_to_vmem [thread:$0]  %s2072_s2, 512, %s32_s30, [#allocation6], %s1835_s25, %s1835_s25, %s1836_s26  }
  0x23   :  { %1828 = dma.done.wait [#allocation3], 512  }
  0x24   :  { %1829 = vsyncadd [#allocation3], 4294966784 }
  0x25   :  { %1830 = dma.done.wait [#allocation6], 512  }
  0x26   :  { %1831 = vsyncadd [#allocation6], 4294966784  ;;  %vm62_vm0 = vcmask 261120   ;;  %v58_v0 = vld [vmem:[#allocation5] sm:$0xff]  ;;  %v59_v1 = vld [vmem:[#allocation5 + $0x8] sm:$0xff]  ;;  %s1838_s29 = smov 96  }
  0x27   :  { %v60_v2 = vld [vmem:[#allocation5 + $0x10] sm:$0xff]  ;;  %v1589_v3 = vpack.c.bf16 %v59_v1, %v58_v0  ;;  %v61_v4 = vld [vmem:[#allocation5 + $0x18] sm:$0xff]  ;;  %v46_v5 = vld [vmem:[%s2070_s0] sm:$0xff]  ;;  %vm600_vm2 = vcmask 195584   ;;  %vm1841_vm3 = vmmov 0   ;;  %s1844_s16 = smov [#allocation7]  }
  0x28   :  { %v1593_v6 = vpack.c.bf16 %v61_v4, %v60_v2  ;;  %1460 = vmatprep.mubr.msk.f32.mxu0 %vm62_vm0, %v46_v5  ;;  %v47_v7 = vld [vmem:[%s2070_s0 + $0x8] sm:$0xff]  ;;  %v54_v8 = vld [vmem:[#allocation2] sm:$0xff]  ;;  %v48_v9 = vld [vmem:[%s2070_s0 + $0x10] sm:$0xff]  ;;  %s1307_s17 = sshll.u32 %s1844_s16, 4  ;;  %vm1299_vm4 = vcmask 517120   ;;  %s1308_s17 = int_to_ptr.vmem [resolvable:$true] %s1307_s17 }
  0x29   :  { %1590 = vmatprep.subr.bf16.mxu0 %v1589_v3  ;;  %v49_v10 = vld [vmem:[%s2070_s0 + $0x18] sm:$0xff]  ;;  %v55_v11 = vld [vmem:[#allocation2 + $0x8] sm:$0xff]  ;;  %v50_v12 = vld [vmem:[%s2070_s0 + $0x20] sm:$0xff]  ;;  %s1806_s18 = scalar_lea.vmem %s1308_s17, 32  ;;  %p1811_p3 = scmp.lt.s32.totalorder %s1308_s17, %s1308_s17 }
  0x2a   :  { %1592 = vmatpush3.bf16.msra.mxu0 %v1589_v3  ;;  %v51_v13 = vld [vmem:[%s2070_s0 + $0x28] sm:$0xff]  ;;  %v56_v14 = vld [vmem:[#allocation2 + $0x10] sm:$0xff]  ;;  %v53_v16 = vld [vmem:[%s2070_s0 + $0x38] sm:$0xff]  ;;  %p1807_p2 = scmp.ne.s32.totalorder %s1308_s17, %s1806_s18  ;;  %p1812_p4 = scmp.lt.s32.totalorder %s1806_s18, %s1806_s18 }
  0x2b   :  { %1594 = vmatprep.subr.bf16.mxu0 %v1593_v6  ;;  %v52_v15 = vld [vmem:[%s2070_s0 + $0x30] sm:$0xff]  ;;  %v57_v17 = vld [vmem:[#allocation2 + $0x18] sm:$0xff]  ;;  %s1839_s0 = smov 64   ;;  %vm1951_vm1 = vmpackc.low %vm62_vm0, %vm62_vm0 }
  0x2c   :  { %p1813_p5 = por %p1812_p4, %p1811_p3 }
  0x2e   :  { %1596 = vmatpush3.bf16.msra.mxu0 %v1593_v6  ;;  %p1814_p6 = pnand %p1813_p5, %p1807_p2 }
  0x31   :  { %1461 = vmatmul.mubr.msk.f32.vlgmr.msra.gmra.mrb[0].mxu0 %vm62_vm0, %v47_v7 }
  0x32   :  { %1463 = vmatprep.mubr.msk.f32.mxu0 %vm62_vm0, %v54_v8 }
  0x35   :  { %1464 = vmatmul.mubr.msk.f32.gmra.mrb[2].mxu0 %vm62_vm0, %v48_v9 }
  0x36   :  { %1466 = vmatprep.mubr.msk.f32.mxu0 %vm62_vm0, %v49_v10 }
  0x39   :  { %1467 = vmatmul.mubr.msk.f32.gmra.mrb[4].mxu0 %vm62_vm0, %v55_v11 }
  0x3a   :  { %1469 = vmatprep.mubr.msk.f32.mxu0 %vm62_vm0, %v50_v12 }
  0x3d   :  { %1470 = vmatmul.mubr.msk.f32.gmra.mrb[6].mxu0 %vm62_vm0, %v51_v13 }
  0x3e   :  { %1472 = vmatprep.mubr.msk.f32.mxu0 %vm62_vm0, %v56_v14 }
  0x41   :  { %1473 = vmatmul.mubr.msk.f32.gmra.mrb[8].mxu0 %vm62_vm0, %v52_v15 }
  0x42   :  { %1475 = vmatprep.mubr.msk.f32.mxu0 %vm62_vm0, %v53_v16 }
  0x45   :  { %1476 = vmatmul.mubr.msk.f32.gmra.mrb[10].mxu0 %vm62_vm0, %v57_v17 }
 0x104   :  { %v1462_v18 = vpop.f32.mrb[0].mxu0 }
 0x105   :  { %v165_v19 = vpop.f32.mrb[1].mxu0 }
 0x106   :  { %v1692_v20 = vpack.i.bf16 %v1462_v18, %v165_v19  ;;  %1484 = vmatprep.mubr.msk.f32.mxu1 %vm62_vm0, %v165_v19 }
 0x108   :  { %1673 = vrot.lane.b32.xlu0 %v1692_v20, %s1838_s29  ;;  %v1465_v21 = vpop.f32.mrb[2].mxu0 }
 0x109   :  { %v175_v22 = vpop.f32.mrb[3].mxu0 }
 0x10c   :  { %v1468_v23 = vpop.f32.mrb[4].mxu0  ;;  %231 = vrot.lane.b32.xlu0 %v175_v22, %s1838_s29 }
 0x10d   :  { %v185_v24 = vpop.f32.mrb[5].mxu0 }
 0x10e   :  { %v1697_v25 = vpack.i.bf16 %v185_v24, %v1465_v21 }
 0x110   :  { %1678 = vrot.lane.b32.xlu1 %v1697_v25, %s1838_s29  ;;  %v1471_v26 = vpop.f32.mrb[6].mxu0  ;;  %325 = vrot.lane.b32.xlu0 %v1468_v23, %s1838_s29 }
 0x111   :  { %v195_v27 = vpop.f32.mrb[7].mxu0 }
 0x112   :  { %v1702_v28 = vpack.i.bf16 %v1471_v26, %v195_v27  ;;  %1502 = vmatprep.mubr.msk.f32.mxu0 %vm62_vm0, %v195_v27 }
 0x114   :  { %1683 = vrot.lane.b32.xlu1 %v1702_v28, %s1838_s29  ;;  %v1474_v29 = vpop.f32.mrb[8].mxu0 }
 0x115   :  { %v1932_v30 = vpop.f32.mrb[9].mxu0 }
 0x116   :  { %419 = vrot.lane.b32.xlu0 %v1932_v30, %s1838_s29 }
 0x118   :  { %v1935_v31 = vpop.f32.mrb[10].mxu0 }
 0x119   :  { %v1937_v32 = vpop.f32.mrb[11].mxu0 }
 0x11a   :  { %v1940_v33 = vpack.i.bf16 %v1937_v32, %v1474_v29  ;;  %677 = vrot.lane.b32.xlu0 %v175_v22, %s1839_s0 }
 0x11c   :  { %1688 = vrot.lane.b32.xlu1 %v1940_v33, %s1838_s29 }
 0x120   :  { %513 = vrot.lane.b32.xlu1 %v1935_v31, %s1838_s29 }
 0x124   :  { %1693 = vrot.lane.b32.xlu1 %v1692_v20, %s1839_s0 }
 0x128   :  { %1698 = vrot.lane.b32.xlu1 %v1697_v25, %s1839_s0 }
 0x12c   :  { %767 = vrot.lane.b32.xlu1 %v1468_v23, %s1839_s0 }
 0x130   :  { %1703 = vrot.lane.b32.xlu1 %v1702_v28, %s1839_s0 }
 0x17a   :  { %v1674_v34 = vpop.permute.xlu0 %1673 }
 0x17b   :  { %v1676_v35 = vunpack.i.h.bf16 %v1674_v34  ;;  %v1675_v36 = vunpack.i.l.bf16 %v1674_v34 }
 0x17d   :  { %v1597_v38 = vpack.c.bf16 %v1676_v35, %v1675_v36 }
 0x17e   :  { %v232_v39 = vpop.permute.xlu0 %231 }
 0x17f   :  { %1599 = vmatprep.subr.msk.bf16.mxu1 %vm1951_vm1, %v1597_v38 }
 0x180   :  { %1602 = vmatpush3.bf16.xpose.msk.msra.mxu1 %vm1951_vm1, %v1597_v38 }
 0x181   :  { %1482 = vmatprep.subr.msk.mxu1 %vm62_vm0, %v232_v39 }
 0x182   :  { %v1679_v40 = vpop.permute.xlu1 %1678  ;;  %v326_v45 = vpop.permute.xlu0 %325 }
 0x183   :  { %v1681_v41 = vunpack.i.h.bf16 %v1679_v40  ;;  %v1680_v42 = vunpack.i.l.bf16 %v1679_v40 }
 0x185   :  { %v1603_v43 = vpack.c.bf16 %v1681_v41, %v1680_v42 }
 0x186   :  { %v1684_v44 = vpop.permute.xlu1 %1683 }
 0x187   :  { %v1686_v46 = vunpack.i.h.bf16 %v1684_v44  ;;  %v1685_v47 = vunpack.i.l.bf16 %v1684_v44 }
 0x188   :  { %1483 = vmatpush3.xpose.msk.msra.mxu1 %vm62_vm0, %v232_v39  ;;  %v420_v49 = vpop.permute.xlu0 %419 }
 0x189   :  { %v1609_v48 = vpack.c.bf16 %v1686_v46, %v1685_v47  ;;  %1605 = vmatprep.subr.msk.bf16.mxu1 %vm1951_vm1, %v1603_v43 }
 0x18b   :  { %1485 = vmatmul.mubr.msk.f32.vlgmr.msra.gmra.mrb[0].mxu1 %vm62_vm0, %v1462_v18  ;;  %1611 = vmatprep.subr.msk.bf16.mxu0 %vm1951_vm1, %v1609_v48 }
 0x18c   :  { %1608 = vmatpush3.bf16.xpose.msk.msra.mxu1 %vm1951_vm1, %v1603_v43  ;;  %1493 = vmatprep.mubr.msk.f32.mxu1 %vm62_vm0, %v1465_v21  ;;  %v678_v62 = vpop.permute.xlu0 %677 }
 0x18d   :  { %1614 = vmatpush3.bf16.xpose.msk.msra.mxu0 %vm1951_vm1, %v1609_v48  ;;  %1491 = vmatprep.subr.msk.mxu1 %vm62_vm0, %v326_v45 }
 0x18e   :  { %v1689_v50 = vpop.permute.xlu1 %1688  ;;  %1500 = vmatprep.subr.msk.mxu0 %vm62_vm0, %v420_v49 }
 0x18f   :  { %v1691_v51 = vunpack.i.h.bf16 %v1689_v50  ;;  %v1690_v52 = vunpack.i.l.bf16 %v1689_v50 }
 0x191   :  { %v1615_v53 = vpack.c.bf16 %v1691_v51, %v1690_v52 }
 0x192   :  { %v514_v54 = vpop.permute.xlu1 %513 }
 0x194   :  { %1492 = vmatpush3.xpose.msk.msra.mxu1 %vm62_vm0, %v326_v45 }
 0x195   :  { %1501 = vmatpush3.xpose.msk.msra.mxu0 %vm62_vm0, %v420_v49  ;;  %1617 = vmatprep.subr.msk.bf16.mxu1 %vm1951_vm1, %v1615_v53 }
 0x196   :  { %v1694_v55 = vpop.permute.xlu1 %1693 }
 0x197   :  { %v1696_v56 = vunpack.i.h.bf16 %v1694_v55  ;;  %v1695_v57 = vunpack.i.l.bf16 %v1694_v55  ;;  %1494 = vmatmul.mubr.msk.f32.vlgmr.msra.gmra.mrb[2].mxu1 %vm62_vm0, %v185_v24 }
 0x198   :  { %1503 = vmatmul.mubr.msk.f32.vlgmr.msra.gmra.mrb[12].mxu0 %vm62_vm0, %v1471_v26  ;;  %1620 = vmatpush3.bf16.xpose.msk.msra.mxu1 %vm1951_vm1, %v1615_v53 }
 0x199   :  { %v1621_v58 = vpack.c.bf16 %v1696_v56, %v1695_v57  ;;  %1511 = vmatprep.mubr.msk.f32.mxu1 %vm62_vm0, %v1474_v29  ;;  %1509 = vmatprep.subr.msk.mxu1 %vm62_vm0, %v514_v54 }
 0x19a   :  { %v1699_v59 = vpop.permute.xlu1 %1698 }
 0x19b   :  { %v1701_v60 = vunpack.i.h.bf16 %v1699_v59  ;;  %v1700_v61 = vunpack.i.l.bf16 %v1699_v59  ;;  %1622 = vmatprep.subr.bf16.mxu0 %v1621_v58 }
 0x19c   :  { %1624 = vmatpush3.bf16.msra.mxu0 %v1621_v58 }
 0x19d   :  { %1518 = vmatprep.subr.mxu0 %v678_v62  ;;  %v1625_v63 = vpack.c.bf16 %v1701_v60, %v1700_v61 }
 0x19e   :  { %v768_v16 = vpop.permute.xlu1 %767 }
 0x1a0   :  { %1510 = vmatpush3.xpose.msk.msra.mxu1 %vm62_vm0, %v514_v54  ;;  %1519 = vmatpush3.msra.mxu0 %v678_v62 }
 0x1a1   :  { %1626 = vmatprep.subr.bf16.mxu0 %v1625_v63 }
 0x1a2   :  { %v1704_v17 = vpop.permute.xlu1 %1703 }
 0x1a3   :  { %1512 = vmatmul.mubr.msk.f32.vlgmr.msra.gmra.mrb[4].mxu1 %vm62_vm0, %v1937_v32 }
 0x25e   :  { %v1486_v0 = vpop.f32.mrb[0].mxu1 }
 0x25f   :  { %v309_v1 = vpop.f32.mrb[1].mxu1  ;;  %v604_v2 = vsel %vm600_vm2, %v1486_v0, -inf }
 0x260   :  { %605 = vmax.xlane.f32.xlu1 %v604_v2  ;;  %v601_v3 = vsel %vm600_vm2, %v309_v1, -inf }
 0x261   :  { %602 = vmax.xlane.f32.xlu0 %v601_v3 }
 0x26a   :  { %v1495_v4 = vpop.f32.mrb[2].mxu1 }
 0x26b   :  { %v1504_v5 = vpop.f32.mrb[12].mxu0  ;;  %v403_v6 = vpop.f32.mrb[3].mxu1  ;;  %v610_v7 = vsel %vm600_vm2, %v1495_v4, -inf }
 0x26c   :  { %v1989_v8 = vpop.f32.mrb[13].mxu0  ;;  %611 = vmax.xlane.f32.xlu0 %v610_v7  ;;  %v616_v9 = vsel %vm600_vm2, %v1504_v5, -inf  ;;  %v607_v10 = vsel %vm600_vm2, %v403_v6, -inf  ;;  %v1051_v7 = vld [vmem:[%s2073_s3 + $0x10] sm:$0xff] }
 0x26d   :  { %v613_v15 = vsel %vm600_vm2, %v1989_v8, -inf }
 0x270   :  { %617 = vmax.xlane.f32.xlu0 %v616_v9 }
 0x271   :  { %857 = vrot.lane.b32.xlu1 %v1932_v30, %s1839_s0  ;;  %v1706_v30 = vunpack.i.h.bf16 %v1704_v17 }
 0x274   :  { %608 = vmax.xlane.f32.xlu0 %v607_v10 }
 0x276   :  { %v1513_v11 = vpop.f32.mrb[4].mxu1 }
 0x277   :  { %v591_v12 = vpop.f32.mrb[5].mxu1  ;;  %v622_v13 = vsel %vm600_vm2, %v1513_v11, -inf }
 0x278   :  { %623 = vmax.xlane.f32.xlu0 %v622_v13  ;;  %v619_v14 = vsel %vm600_vm2, %v591_v12, -inf }
 0x27c   :  { %620 = vmax.xlane.f32.xlu0 %v619_v14 }
 0x292   :  { %1708 = vrot.lane.b32.xlu0 %v1940_v33, %s1839_s0 }
 0x295   :  { %614 = vmax.xlane.f32.xlu1 %v613_v15 }
 0x2a6   :  { %947 = vrot.lane.b32.xlu1 %v1935_v31, %s1839_s0  ;;  %v1705_v31 = vunpack.i.l.bf16 %v1704_v17 }
 0x2a8   :  { %v1629_v35 = vpack.c.bf16 %v1706_v30, %v1705_v31 }
 0x2ed   :  { %v606_v18 = vpop.xlane.xlu1 %605 }
 0x2ee   :  { %v626_v19 = vsub.f32 %v1486_v0, %v606_v18  ;;  %v603_v20 = vpop.xlane.xlu0 %602 }
 0x2ef   :  { %v625_v21 = vsub.f32 %v309_v1, %v603_v20 }
 0x2f0   :  { %v635_v22 = vmul.f32 1.442695, %v626_v19 }
 0x2f1   :  { %v633_v23 = vmul.f32 1.442695, %v625_v21  ;;  %v858_v54 = vpop.permute.xlu1 %857 }
 0x2f2   :  { %1714 = vpow2.f32 %v635_v22 }
 0x2f3   :  { %1716 = vpow2.f32 %v633_v23 }
 0x2f9   :  { %v612_v24 = vpop.xlane.xlu0 %611 }
 0x2fa   :  { %v628_v32 = vsub.f32 %v1495_v4, %v612_v24  ;;  %v1049_v4 = vld [vmem:[%s2073_s3] sm:$0xff] }
 0x2fc   :  { %v1715_v25 = vpop.eup %1714  ;;  %v639_v36 = vmul.f32 1.442695, %v628_v32 }
 0x2fd   :  { %v1717_v26 = vpop.eup %1716  ;;  %v618_v27 = vpop.xlane.xlu0 %617  ;;  %v652_v28 = vsel %vm600_vm2, %v1715_v25, 0.0 }
 0x2fe   :  { %1520 = vmatprep.mubr.msk.f32.mxu0 %vm600_vm2, %v1717_v26  ;;  %653 = vadd.xlane.f32.xlu1 %v652_v28  ;;  %v649_v29 = vsel %vm600_vm2, %v1717_v26, 0.0  ;;  %v630_v38 = vsub.f32 %v1504_v5, %v618_v27  ;;  %v1050_v5 = vld [vmem:[%s2073_s3 + $0x8] sm:$0xff] }
 0x2ff   :  { %1521 = vmatmul.mubr.msk.f32.vlgmr.msra.gmra.mrb[14].mxu0 %vm600_vm2, %v1715_v25  ;;  %650 = vadd.xlane.f32.xlu0 %v649_v29 }
 0x300   :  { %1628 = vmatpush3.bf16.msra.mxu0 %v1625_v63  ;;  %v643_v41 = vmul.f32 1.442695, %v630_v38 }
 0x301   :  { %1527 = vmatprep.subr.mxu0 %v768_v16  ;;  %v609_v33 = vpop.xlane.xlu0 %608 }
 0x302   :  { %v627_v34 = vsub.f32 %v403_v6, %v609_v33  ;;  %v1637_v6 = vpack.c.bf16 %v1050_v5, %v1049_v4 }
 0x304   :  { %v637_v39 = vmul.f32 1.442695, %v627_v34  ;;  %1528 = vmatpush3.msra.mxu0 %v768_v16 }
 0x305   :  { %1630 = vmatprep.subr.bf16.mxu0 %v1629_v35  ;;  %v624_v40 = vpop.xlane.xlu0 %623 }
 0x306   :  { %1718 = vpow2.f32 %v637_v39  ;;  %v632_v42 = vsub.f32 %v1513_v11, %v624_v40 }
 0x307   :  { %1720 = vpow2.f32 %v639_v36 }
 0x308   :  { %1722 = vpow2.f32 %v643_v41  ;;  %v647_v45 = vmul.f32 1.442695, %v632_v42 }
 0x309   :  { %v621_v43 = vpop.xlane.xlu0 %620 }
 0x30a   :  { %v631_v44 = vsub.f32 %v591_v12, %v621_v43  ;;  %v1840_v43 = vmov 0.0|0.0  }
 0x30c   :  { %v645_v46 = vmul.f32 1.442695, %v631_v44  ;;  %v1842_v44 = vmov 0.0  }
 0x30d   :  { %v1709_v47 = vpop.permute.xlu0 %1708 }
 0x30e   :  { %1724 = vpow2.f32 %v645_v46  ;;  %v1711_v48 = vunpack.i.h.bf16 %v1709_v47  ;;  %v1710_v49 = vunpack.i.l.bf16 %v1709_v47  ;;  %v1843_v46 = vmov 0   ;;  %v1357_v47 = vld [vmem:[%s2073_s3 + $0x20] ss:$0 sm:$0xff] }
 0x30f   :  { %1726 = vpow2.f32 %v647_v45  ;;  %v1055_v45 = vld [vmem:[%s2073_s3 + $0x23] sm:$0x3]  ;;  %1712 = vset.pattern.permute.xlu1 %v1843_v46  ;;  %1713 = vset.pattern.permute.xlu0 %v1843_v46 }
 0x310   :  { %v1719_v50 = vpop.eup %1718  ;;  %v1633_v51 = vpack.c.bf16 %v1711_v48, %v1710_v49 }
 0x311   :  { %v1721_v52 = vpop.eup %1720  ;;  %1529 = vmatprep.mubr.msk.f32.mxu0 %vm600_vm2, %v1719_v50  ;;  %v655_v53 = vsel %vm600_vm2, %v1719_v50, 0.0 }
 0x312   :  { %1530 = vmatmul.mubr.msk.f32.vlgmr.msra.gmra.mrb[16].mxu0 %vm600_vm2, %v1721_v52  ;;  %656 = vadd.xlane.f32.xlu0 %v655_v53  ;;  %v658_v55 = vsel %vm600_vm2, %v1721_v52, 0.0  ;;  %v1723_v56 = vpop.eup %1722 }
 0x313   :  { %1632 = vmatpush3.bf16.msra.mxu0 %v1629_v35  ;;  %1634 = vmatprep.subr.bf16.mxu1 %v1633_v51  ;;  %v664_v58 = vsel %vm600_vm2, %v1723_v56, 0.0 }
 0x314   :  { %1536 = vmatprep.subr.mxu0 %v858_v54  ;;  %1636 = vmatpush3.bf16.msra.mxu1 %v1633_v51 }
 0x316   :  { %659 = vadd.xlane.f32.xlu0 %v658_v55 }
 0x317   :  { %1537 = vmatpush3.msra.mxu0 %v858_v54 }
 0x318   :  { %v1725_v57 = vpop.eup %1724  ;;  %1638 = vmatprep.subr.bf16.mxu0 %v1637_v6 }
 0x319   :  { %1547 = vmatprep.mubr.msk.f32.mxu1 %vm600_vm2, %v1725_v57  ;;  %v1727_v59 = vpop.eup %1726  ;;  %v667_v3 = vsel %vm600_vm2, %v1725_v57, 0.0 }
 0x31a   :  { %665 = vadd.xlane.f32.xlu0 %v664_v58  ;;  %v670_v60 = vsel %vm600_vm2, %v1727_v59, 0.0 }
 0x31e   :  { %671 = vadd.xlane.f32.xlu0 %v670_v60 }
 0x322   :  { %v615_v61 = vpop.xlane.xlu1 %614 }
 0x323   :  { %v629_v62 = vsub.f32 %v1989_v8, %v615_v61  ;;  %v1052_v8 = vld [vmem:[%s2073_s3 + $0x18] sm:$0xff] }
 0x324   :  { %v1641_v9 = vpack.c.bf16 %v1052_v8, %v1051_v7 }
 0x325   :  { %v641_v63 = vmul.f32 1.442695, %v629_v62 }
 0x326   :  { %v948_v0 = vpop.permute.xlu1 %947 }
 0x327   :  { %1728 = vpow2.f32 %v641_v63  ;;  %1545 = vmatprep.subr.mxu1 %v948_v0 }
 0x328   :  { %1546 = vmatpush3.msra.mxu1 %v948_v0 }
 0x329   :  { %1548 = vmatmul.mubr.msk.f32.vlgmr.msra.gmra.mrb[6].mxu1 %vm600_vm2, %v1727_v59  ;;  %1645 = vmatprep.subr.bf16.mxu1 %v1840_v43 }
 0x32a   :  { %1586 = vmatprep.mubr.msk.f32.mxu1 %vm1841_vm3, %v1842_v44 }
 0x331   :  { %v1729_v1 = vpop.eup %1728 }
 0x332   :  { %1538 = vmatprep.mubr.msk.f32.mxu0 %vm600_vm2, %v1729_v1  ;;  %v661_v2 = vsel %vm600_vm2, %v1729_v1, 0.0 }
 0x333   :  { %1539 = vmatmul.mubr.msk.f32.vlgmr.msra.gmra.mrb[18].mxu0 %vm600_vm2, %v1723_v56  ;;  %662 = vadd.xlane.f32.xlu1 %v661_v2 }
 0x334   :  { %1640 = vmatpush3.bf16.msra.mxu0 %v1637_v6 }
 0x335   :  { %1642 = vmatprep.subr.bf16.mxu0 %v1641_v9 }
 0x337   :  { %668 = vadd.xlane.f32.xlu1 %v667_v3 }
 0x338   :  { %1644 = vmatpush3.bf16.msra.mxu0 %v1641_v9 }
 0x348   :  { %1199 = vperm.xlu1 %1712, %v1055_v45  }
 0x38b   :  { %v654_v11 = vpop.xlane.xlu1 %653 }
 0x38c   :  { %v651_v10 = vpop.xlane.xlu0 %650 }
 0x38d   :  { %1730 = vrcp.f32 %v651_v10 }
 0x38e   :  { %1732 = vrcp.f32 %v654_v11 }
 0x397   :  { %v1731_v13 = vpop.eup %1730 }
 0x398   :  { %v1733_v15 = vpop.eup %1732 }
 0x39f   :  { %v657_v16 = vpop.xlane.xlu0 %656 }
 0x3a0   :  { %1734 = vrcp.f32 %v657_v16 }
 0x3a3   :  { %v660_v19 = vpop.xlane.xlu0 %659 }
 0x3a4   :  { %1736 = vrcp.f32 %v660_v19 }
 0x3a7   :  { %v666_v27 = vpop.xlane.xlu0 %665 }
 0x3aa   :  { %v1735_v21 = vpop.eup %1734 }
 0x3ab   :  { %v672_v31 = vpop.xlane.xlu0 %671 }
 0x3ae   :  { %v1737_v23 = vpop.eup %1736 }
 0x3c0   :  { %v663_v26 = vpop.xlane.xlu1 %662 }
 0x3c1   :  { %1738 = vrcp.f32 %v663_v26 }
 0x3c2   :  { %1740 = vrcp.f32 %v666_v27 }
 0x3c4   :  { %v669_v28 = vpop.xlane.xlu1 %668 }
 0x3c5   :  { %1742 = vrcp.f32 %v669_v28 }
 0x3c6   :  { %1744 = vrcp.f32 %v672_v31 }
 0x3cb   :  { %v1739_v33 = vpop.eup %1738 }
 0x3cc   :  { %v1741_v35 = vpop.eup %1740 }
 0x3cf   :  { %v1743_v38 = vpop.eup %1742 }
 0x3d0   :  { %v1745_v41 = vpop.eup %1744 }
 0x3d2   :  { %v1522_v12 = vpop.f32.mrb[14].mxu0 }
 0x3d3   :  { %v754_v14 = vpop.f32.mrb[15].mxu0  ;;  %v1036_v18 = vmul.f32 %v1733_v15, %v1522_v12  ;;  %v1054_v12 = vld [vmem:[%s2073_s3 + $0x21] sm:$0x3] }
 0x3d4   :  { %v1034_v17 = vmul.f32 %v1731_v13, %v754_v14  ;;  %v1200_v13 = vpop.permute.xlu1 %1199 }
 0x3d6   :  { %1558 = vmatprep.mubr.msk.f32.mxu0 %vm62_vm0, %v1034_v17 }
 0x3d7   :  { %1559 = vmatmul.mubr.msk.f32.vlgmr.msra.gmra.mrb[20].mxu0 %vm62_vm0, %v1036_v18 }
 0x3e5   :  { %v1531_v20 = vpop.f32.mrb[16].mxu0 }
 0x3e6   :  { %v844_v22 = vpop.f32.mrb[17].mxu0  ;;  %v1040_v25 = vmul.f32 %v1737_v23, %v1531_v20 }
 0x3e7   :  { %v1038_v24 = vmul.f32 %v1735_v21, %v844_v22 }
 0x3e9   :  { %1561 = vmatprep.mubr.msk.f32.mxu0 %vm62_vm0, %v1038_v24 }
 0x3ea   :  { %1562 = vmatmul.mubr.msk.f32.gmra.mrb[22].mxu0 %vm62_vm0, %v1040_v25 }
 0x3fc   :  { %v1549_v29 = vpop.f32.mrb[6].mxu1 }
 0x3fd   :  { %v1024_v30 = vpop.f32.mrb[7].mxu1  ;;  %v1048_v42 = vmul.f32 %v1745_v41, %v1549_v29 }
 0x3fe   :  { %v1046_v40 = vmul.f32 %v1743_v38, %v1024_v30 }
 0x406   :  { %v1540_v32 = vpop.f32.mrb[18].mxu0 }
 0x407   :  { %v934_v34 = vpop.f32.mrb[19].mxu0  ;;  %v1044_v39 = vmul.f32 %v1741_v35, %v1540_v32 }
 0x408   :  { %v1042_v36 = vmul.f32 %v1739_v33, %v934_v34 }
 0x40a   :  { %1564 = vmatprep.mubr.msk.f32.mxu0 %vm62_vm0, %v1042_v36 }
 0x40b   :  { %1565 = vmatmul.mubr.msk.f32.gmra.mrb[24].mxu0 %vm62_vm0, %v1044_v39 }
 0x40c   :  { %1567 = vmatprep.mubr.msk.f32.mxu0 %vm62_vm0, %v1046_v40 }
 0x40f   :  { %1568 = vmatmul.mubr.msk.f32.gmra.mrb[26].mxu0 %vm62_vm0, %v1048_v42 }
 0x4aa   :  { %v1560_v48 = vpop.f32.mrb[20].mxu0 }
 0x4ab   :  { %v1156_v49 = vadd.f32 %v1560_v48, %v1357_v47  ;;  %v1150_v50 = vpop.f32.mrb[21].mxu0 }
 0x4ac   :  { %v1151_v51 = vadd.f32 %v1357_v47, %v1150_v50 }
 0x4ad   :  { %1746 = vtanh.f32 %v1156_v49 }
 0x4ae   :  { %1748 = vtanh.f32 %v1151_v51 }
 0x4b7   :  { %v1747_v52 = vpop.eup %1746 }
 0x4b8   :  { %v1749_v53 = vpop.eup %1748 }
 0x4b9   :  { %v1646_v54 = vpack.c.bf16 %v1747_v52, %v1749_v53 }
 0x4bb   :  { %1648 = vmatpush3.bf16.xpose.msk.msra.mxu1 %vm1951_vm1, %v1646_v54 }
 0x4bc   :  { %1649 = vmatprep.subr.bf16.mxu1 %v1840_v43 }
 0x4bd   :  { %v1563_v55 = vpop.f32.mrb[22].mxu0 }
 0x4be   :  { %v1166_v56 = vadd.f32 %v1563_v55, %v1357_v47  ;;  %v1160_v57 = vpop.f32.mrb[23].mxu0 }
 0x4bf   :  { %v1161_v58 = vadd.f32 %v1357_v47, %v1160_v57 }
 0x4c0   :  { %1750 = vtanh.f32 %v1166_v56 }
 0x4c1   :  { %1752 = vtanh.f32 %v1161_v58 }
 0x4ca   :  { %v1751_v59 = vpop.eup %1750 }
 0x4cb   :  { %v1753_v60 = vpop.eup %1752 }
 0x4cc   :  { %v1650_v61 = vpack.c.bf16 %v1751_v59, %v1753_v60 }
 0x4ce   :  { %1652 = vmatpush3.bf16.xpose.msk.msra.mxu1 %vm1951_vm1, %v1650_v61 }
 0x4cf   :  { %1653 = vmatprep.subr.bf16.mxu1 %v1840_v43 }
 0x4de   :  { %v1566_v62 = vpop.f32.mrb[24].mxu0 }
 0x4df   :  { %v1176_v63 = vadd.f32 %v1566_v62, %v1357_v47  ;;  %v1170_v0 = vpop.f32.mrb[25].mxu0 }
 0x4e0   :  { %v1171_v1 = vadd.f32 %v1357_v47, %v1170_v0 }
 0x4e1   :  { %1754 = vtanh.f32 %v1176_v63 }
 0x4e2   :  { %1756 = vtanh.f32 %v1171_v1  ;;  %v1569_v2 = vpop.f32.mrb[26].mxu0 }
 0x4e3   :  { %v1186_v3 = vadd.f32 %v1569_v2, %v1357_v47  ;;  %v1180_v4 = vpop.f32.mrb[27].mxu0 }
 0x4e4   :  { %v1181_v5 = vadd.f32 %v1357_v47, %v1180_v4 }
 0x4e5   :  { %1758 = vtanh.f32 %v1186_v3 }
 0x4e6   :  { %1760 = vtanh.f32 %v1181_v5 }
 0x4eb   :  { %v1755_v6 = vpop.eup %1754 }
 0x4ec   :  { %v1757_v7 = vpop.eup %1756 }
 0x4ed   :  { %v1654_v8 = vpack.c.bf16 %v1755_v6, %v1757_v7 }
 0x4ef   :  { %v1759_v9 = vpop.eup %1758  ;;  %1656 = vmatpush3.bf16.xpose.msk.msra.mxu1 %vm1951_vm1, %v1654_v8 }
 0x4f0   :  { %v1761_v10 = vpop.eup %1760  ;;  %1657 = vmatprep.subr.bf16.mxu1 %v1840_v43 }
 0x4f1   :  { %v1658_v11 = vpack.c.bf16 %v1759_v9, %v1761_v10 }
 0x4f7   :  { %1660 = vmatpush3.bf16.xpose.msk.msra.mxu1 %vm1951_vm1, %v1658_v11 }
 0x4fe   :  { %1587 = vmatmul.mubr.msk.f32.vlgmr.msra.gmra.mrb[8].mxu1 %vm62_vm0, %v1054_v12 }
 0x5d1   :  { %v1295_v14 = vpop.f32.mrb[8].mxu1 }
 0x5d2   :  { %v1296_v15 = vadd.f32 %v1295_v14, %v1200_v13  ;;  %v1588_v16 = vpop.f32.mrb[9].mxu1 }
 0x5d4   :  { %1300 = vst.msk [vmem:[#allocation7] sm:$0x3] %vm1299_vm4, %v1296_v15 }
 0x5d5   :  { %1817 = shalt.err (!%p1814_p6)
}
 0x5d6   :  { %s1818_s20 = scalar_lea.hbm %s2074_s4, 32 }
 0x5d7   :  { %p1819_p7 = scmp.ne.s32.totalorder %s2074_s4, %s1818_s20  ;;  %p1822_p8 = scmp.lt.u32.totalorder %s1818_s20, %s2074_s4 }
 0x5d9   :  { %p1824_p9 = pnand %p1822_p8, %p1819_p7 }
 0x5db   :  { %1827 = shalt.err (!%p1824_p9)
}
 0x5dc   :  { %1310 = dma.vmem_to_hbm [thread:$0]  %s1308_s17, 32, %s2074_s4, [#allocation4]  }
 0x5dd   :  { %1832 = dma.done.wait [#allocation4], 32  }
 0x5de   :  { %1833 = vsyncadd [#allocation4], 4294967264 }
 0x5df   :  { %1314 = vsyncpa [#allocation3], 1 }
 0x5e0   :  { %1315 = vsyncpa [#allocation6], 1 }
 0x5e1   :  { %1316 = vsyncpa [#allocation4], 1 }

</bundles_post_ra>
